<compile_context>
chip_gen: v7x
topology: tpu7x:2x2x1
jax: 0.10.0
libtpu: 0.0.40
codegen_flags: <defaults>
</compile_context>

<pallas_src>
import math
import jax
import jax.numpy as jnp
from jax.experimental import pallas as pl
from jax.experimental.pallas import tpu as pltpu


def token_embedding_kernel(ids_ref, pos_ref, emb_ref, pe_ref, gamma_ref, beta_ref,
                           out_ref, x_ref):
    # ids_ref/pos_ref : (M_pad,) int32 in SMEM (scalar prefetch)
    # emb_ref         : (V, D)   VMEM-resident embedding table
    # pe_ref          : (L, D)   VMEM-resident positional-encoding table
    # gamma/beta      : (1, D)   LayerNorm affine params
    # out_ref         : (T, D)   output token block
    # x_ref           : (T, D)   f32 VMEM scratch (gathered rows)
    T, D = out_ref.shape
    base = pl.program_id(0) * T

    def gather_one(i, carry):
        tid = ids_ref[base + i]          # token id  -> embedding row
        pid = pos_ref[base + i]          # seq pos   -> PE row
        row = (emb_ref[pl.ds(tid, 1), :].astype(jnp.float32)
               + pe_ref[pl.ds(pid, 1), :].astype(jnp.float32))
        x_ref[pl.ds(i, 1), :] = row
        return carry

    jax.lax.fori_loop(0, T, gather_one, 0)

    # TODO(synk): training-mode dropout (p=dropout_in) not applied (inference).
    x = x_ref[...]
    inv_d = jnp.float32(1.0 / D)
    mean = jnp.sum(x, axis=-1, keepdims=True) * inv_d
    xc = x - mean
    var = jnp.sum(xc * xc, axis=-1, keepdims=True) * inv_d
    inv = jax.lax.rsqrt(var + 1e-12)                       # LayerNorm eps=1e-12
    scale = inv * gamma_ref[...].astype(jnp.float32)       # fold gamma into 1/sigma
    out_ref[...] = (xc * scale + beta_ref[...].astype(jnp.float32)).astype(out_ref.dtype)


def token_embedding_forward(ids, emb_table, pe, gamma, beta, *, block_tokens=256):
    """ids: (B, E, S) int32. Returns (B*E, S, D) f32."""
    B, E, S = ids.shape
    N = B * E
    M = N * S
    V, D = emb_table.shape
    L = pe.shape[0]

    T = block_tokens
    M_pad = ((M + T - 1) // T) * T
    num_blocks = M_pad // T

    # Flat 1-D token ids + per-token sequence positions (SMEM-friendly layout).
    ids_flat = ids.reshape(M).astype(jnp.int32)
    pos_flat = (jnp.arange(M, dtype=jnp.int32) % S).astype(jnp.int32)
    pad = M_pad - M
    if pad:
        ids_flat = jnp.concatenate([ids_flat, jnp.zeros((pad,), jnp.int32)])
        pos_flat = jnp.concatenate([pos_flat, jnp.zeros((pad,), jnp.int32)])

    grid_spec = pltpu.PrefetchScalarGridSpec(
        num_scalar_prefetch=2,
        grid=(num_blocks,),
        in_specs=[
            # Whole embedding table resident in VMEM (constant block index ->
            # fetched once, not re-DMA'd per grid step).
            pl.BlockSpec((V, D), lambda b, ids_s, pos_s: (0, 0)),
            # Whole PE table resident in VMEM.
            pl.BlockSpec((L, D), lambda b, ids_s, pos_s: (0, 0)),
            # LayerNorm gamma / beta resident.
            pl.BlockSpec((1, D), lambda b, ids_s, pos_s: (0, 0)),
            pl.BlockSpec((1, D), lambda b, ids_s, pos_s: (0, 0)),
        ],
        # Lane/sublane-dense (T, 128) output tile.
        out_specs=pl.BlockSpec((T, D), lambda b, ids_s, pos_s: (b, 0)),
        scratch_shapes=[pltpu.VMEM((T, D), jnp.float32)],
    )

    # Bandwidth-bound hint for XLA's scheduler.
    cost = pl.CostEstimate(
        flops=8 * M_pad * D,
        transcendentals=M_pad,
        bytes_accessed=V * D * 4 + L * D * 4 + 2 * M_pad * D * 4,
    )

    out = pl.pallas_call(
        token_embedding_kernel,
        out_shape=jax.ShapeDtypeStruct((M_pad, D), jnp.float32),
        grid_spec=grid_spec,
        compiler_params=pltpu.CompilerParams(
            dimension_semantics=("parallel",),
            # Resident f32 table (+ possible double buffer) + tiles < 48 MiB,
            # fits v5e/v6e (128 MiB) and v7x (64 MiB) physical VMEM.
            vmem_limit_bytes=48 * 1024 * 1024,
        ),
        cost_estimate=cost,
    )(ids_flat, pos_flat, emb_table, pe, gamma, beta)

    return out[:M].reshape(N, S, D)


def make_positional_encoding(sequence_len, dim):
    position = jnp.arange(sequence_len, dtype=jnp.float32)[:, None]        # (L, 1)
    div_term = jnp.exp(jnp.arange(0, dim, 2, dtype=jnp.float32)
                       * (-math.log(10000.0) / dim))                       # (D/2,)
    pe = jnp.zeros((sequence_len, dim), dtype=jnp.float32)
    pe = pe.at[:, 0::2].set(jnp.sin(position * div_term))
    pe = pe.at[:, 1::2].set(jnp.cos(position * div_term))
    return pe


def reference_forward(ids, emb_table, pe, gamma, beta):
    B, E, S = ids.shape
    D = emb_table.shape[1]
    x = emb_table[ids]                                   # (B, E, S, D)
    x = x.reshape(B * E, S, D) + pe[None, :S, :]
    mean = jnp.mean(x, axis=-1, keepdims=True)
    var = jnp.mean((x - mean) ** 2, axis=-1, keepdims=True)
    return (x - mean) / jnp.sqrt(var + 1e-12) * gamma[0] + beta[0]


if __name__ == "__main__":
    # Module hyperparameters (defaults from __init__)
    emb_in = 128
    max_token_size = 128
    tokenizer_size = 28996

    # Small example input consistent with forward(): token ids of shape (B, E, S)
    B, E, S = 2, 3, 8
    key = jax.random.PRNGKey(0)
    k_emb, k_ids = jax.random.split(key)

    # Deterministic parameter init:
    #   nn.Embedding(tokenizer_size, emb_in, padding_idx=0): N(0,1), row 0 zeroed
    emb_table = jax.random.normal(k_emb, (tokenizer_size, emb_in), dtype=jnp.float32)
    emb_table = emb_table.at[0].set(0.0)
    #   nn.LayerNorm(emb_in): weight=1, bias=0
    gamma = jnp.ones((1, emb_in), dtype=jnp.float32)
    beta = jnp.zeros((1, emb_in), dtype=jnp.float32)
    #   PositionalEncoding buffer
    pe = make_positional_encoding(max_token_size, emb_in)

    ids = jax.random.randint(k_ids, (B, E, S), 0, tokenizer_size, dtype=jnp.int32)

    out = token_embedding_forward(ids, emb_table, pe, gamma, beta)
    out = jax.block_until_ready(out)

    ref = reference_forward(ids, emb_table, pe, gamma, beta)
    assert out.shape == (B * E, S, emb_in)
    assert jnp.allclose(out, ref, atol=1e-4, rtol=1e-4)

    print("KERNEL_OK")
</pallas_src>

<mosaic_0001>
module attributes {stable_mosaic.version = 11 : i64} {
  func.func @token_embedding_kernel(%arg0: i32, %arg1: memref<256xi32, #tpu.memory_space<smem>>, %arg2: memref<256xi32, #tpu.memory_space<smem>>, %arg3: memref<28996x128xf32, #tpu.memory_space<vmem>>, %arg4: memref<128x128xf32, #tpu.memory_space<vmem>>, %arg5: memref<1x128xf32, #tpu.memory_space<vmem>>, %arg6: memref<1x128xf32, #tpu.memory_space<vmem>>, %arg7: memref<256x128xf32, #tpu.memory_space<vmem>>, %arg8: memref<256x128xf32, #tpu.memory_space<vmem>>) attributes {dimension_semantics = [#tpu.dimension_semantics<parallel>], iteration_bounds = array<i64: 1>, scalar_prefetch = 2 : i64, scratch_operands = 1 : i64, tpu.core_type = #tpu.core_type<tc>, window_params = [{pipeline_mode = #tpu.pipeline_mode<synchronous>, transform_indices = @transform_0, window_bounds = array<i64: 28996, 128>}, {pipeline_mode = #tpu.pipeline_mode<synchronous>, transform_indices = @transform_1, window_bounds = array<i64: 128, 128>}, {pipeline_mode = #tpu.pipeline_mode<synchronous>, transform_indices = @transform_2, window_bounds = array<i64: 1, 128>}, {pipeline_mode = #tpu.pipeline_mode<synchronous>, transform_indices = @transform_3, window_bounds = array<i64: 1, 128>}, {transform_indices = @transform_4, window_bounds = array<i64: 256, 128>}]} {
    %c256_i32 = arith.constant 256 : i32
    %0 = arith.muli %arg0, %c256_i32 : i32
    %c0_i32 = arith.constant 0 : i32
    %c256_i32_0 = arith.constant 256 : i32
    %1 = arith.addi %c0_i32, %c256_i32_0 : i32
    %c1_i32 = arith.constant 1 : i32
    scf.for %arg9 = %c0_i32 to %1 step %c1_i32  : i32 {
      %26 = arith.addi %0, %arg9 : i32
      %27 = arith.index_cast %26 : i32 to index
      %28 = memref.load %arg1[%27] : memref<256xi32, #tpu.memory_space<smem>>
      %29 = arith.addi %0, %arg9 : i32
      %30 = arith.index_cast %29 : i32 to index
      %31 = memref.load %arg2[%30] : memref<256xi32, #tpu.memory_space<smem>>
      %32 = arith.index_cast %28 : i32 to index
      %c0_13 = arith.constant 0 : index
      %33 = vector.load %arg3[%32, %c0_13] : memref<28996x128xf32, #tpu.memory_space<vmem>>, vector<1x128xf32>
      %34 = arith.index_cast %31 : i32 to index
      %c0_14 = arith.constant 0 : index
      %35 = vector.load %arg4[%34, %c0_14] : memref<128x128xf32, #tpu.memory_space<vmem>>, vector<1x128xf32>
      %36 = arith.addf %33, %35 : vector<1x128xf32>
      %37 = arith.index_cast %arg9 : i32 to index
      %c0_15 = arith.constant 0 : index
      %38 = vector.load %arg8[%37, %c0_15] : memref<256x128xf32, #tpu.memory_space<vmem>>, vector<1x128xf32>
      tpu.vector_store %arg8[%37, %c0_15], %36 {strides = array<i32>} : memref<256x128xf32, #tpu.memory_space<vmem>>, vector<1x128xf32>,
    }
    %c256_i32_1 = arith.constant 256 : i32
    %c0 = arith.constant 0 : index
    %c0_2 = arith.constant 0 : index
    %2 = vector.load %arg8[%c0, %c0_2] : memref<256x128xf32, #tpu.memory_space<vmem>>, vector<256x128xf32>
    %cst = arith.constant dense<0.000000e+00> : vector<256xf32>
    %3 = vector.multi_reduction <add>, %2, %cst [1] : vector<256x128xf32> to vector<256xf32>
    %4 = vector.shape_cast %3 : vector<256xf32> to vector<256x1xf32>
    %cst_3 = arith.constant 7.812500e-03 : f32
    %5 = vector.broadcast %cst_3 : f32 to vector<256x1xf32>
    %6 = arith.mulf %4, %5 : vector<256x1xf32>
    %7 = vector.broadcast %6 : vector<256x1xf32> to vector<256x128xf32>
    %8 = arith.subf %2, %7 : vector<256x128xf32>
    %9 = arith.mulf %8, %8 : vector<256x128xf32>
    %cst_4 = arith.constant dense<0.000000e+00> : vector<256xf32>
    %10 = vector.multi_reduction <add>, %9, %cst_4 [1] : vector<256x128xf32> to vector<256xf32>
    %11 = vector.shape_cast %10 : vector<256xf32> to vector<256x1xf32>
    %cst_5 = arith.constant 7.812500e-03 : f32
    %12 = vector.broadcast %cst_5 : f32 to vector<256x1xf32>
    %13 = arith.mulf %11, %12 : vector<256x1xf32>
    %cst_6 = arith.constant 9.99999996E-13 : f32
    %14 = vector.broadcast %cst_6 : f32 to vector<256x1xf32>
    %15 = arith.addf %13, %14 : vector<256x1xf32>
    %16 = math.rsqrt %15 : vector<256x1xf32>
    %c0_7 = arith.constant 0 : index
    %c0_8 = arith.constant 0 : index
    %17 = vector.load %arg5[%c0_7, %c0_8] : memref<1x128xf32, #tpu.memory_space<vmem>>, vector<1x128xf32>
    %18 = vector.broadcast %16 : vector<256x1xf32> to vector<256x128xf32>
    %19 = vector.broadcast %17 : vector<1x128xf32> to vector<256x128xf32>
    %20 = arith.mulf %18, %19 : vector<256x128xf32>
    %21 = arith.mulf %8, %20 : vector<256x128xf32>
    %c0_9 = arith.constant 0 : index
    %c0_10 = arith.constant 0 : index
    %22 = vector.load %arg6[%c0_9, %c0_10] : memref<1x128xf32, #tpu.memory_space<vmem>>, vector<1x128xf32>
    %23 = vector.broadcast %22 : vector<1x128xf32> to vector<256x128xf32>
    %24 = arith.addf %21, %23 : vector<256x128xf32>
    %c0_11 = arith.constant 0 : index
    %c0_12 = arith.constant 0 : index
    %25 = vector.load %arg7[%c0_11, %c0_12] : memref<256x128xf32, #tpu.memory_space<vmem>>, vector<256x128xf32>
    tpu.vector_store %arg7[%c0_11, %c0_12], %24 {strides = array<i32>} : memref<256x128xf32, #tpu.memory_space<vmem>>, vector<256x128xf32>,
    return
  }
  func.func @transform_0(%arg0: i32, %arg1: memref<256xi32, #tpu.memory_space<smem>>, %arg2: memref<256xi32, #tpu.memory_space<smem>>) -> (i32, i32) {
    %c0_i32 = arith.constant 0 : i32
    %c0_i32_0 = arith.constant 0 : i32
    %c0_i32_1 = arith.constant 0 : i32
    return %c0_i32, %c0_i32_0 : i32, i32
  }
  func.func @transform_1(%arg0: i32, %arg1: memref<256xi32, #tpu.memory_space<smem>>, %arg2: memref<256xi32, #tpu.memory_space<smem>>) -> (i32, i32) {
    %c0_i32 = arith.constant 0 : i32
    %c0_i32_0 = arith.constant 0 : i32
    %c0_i32_1 = arith.constant 0 : i32
    return %c0_i32, %c0_i32_0 : i32, i32
  }
  func.func @transform_2(%arg0: i32, %arg1: memref<256xi32, #tpu.memory_space<smem>>, %arg2: memref<256xi32, #tpu.memory_space<smem>>) -> (i32, i32) {
    %c0_i32 = arith.constant 0 : i32
    %c0_i32_0 = arith.constant 0 : i32
    %c0_i32_1 = arith.constant 0 : i32
    return %c0_i32, %c0_i32_0 : i32, i32
  }
  func.func @transform_3(%arg0: i32, %arg1: memref<256xi32, #tpu.memory_space<smem>>, %arg2: memref<256xi32, #tpu.memory_space<smem>>) -> (i32, i32) {
    %c0_i32 = arith.constant 0 : i32
    %c0_i32_0 = arith.constant 0 : i32
    %c0_i32_1 = arith.constant 0 : i32
    return %c0_i32, %c0_i32_0 : i32, i32
  }
  func.func @transform_4(%arg0: i32, %arg1: memref<256xi32, #tpu.memory_space<smem>>, %arg2: memref<256xi32, #tpu.memory_space<smem>>) -> (i32, i32) {
    %c0_i32 = arith.constant 0 : i32
    %c0_i32_0 = arith.constant 0 : i32
    return %arg0, %c0_i32 : i32, i32
  }
}

</mosaic_0001>

<bundles_post_ra>
// kernel: tpu_custom_call.1
= control target key start
LH: loop header
LB: loop body
LE: loop exit
PB: predicated region body
PF: predicated region fallthrough
CT: control target
= control target key end

     0   :  { %s1346_s0 = inlined_call_operand.hbm [shape: s32[256], index: 0, kind: input, shape index: {}]   ;;  %s1347_s2 = inlined_call_operand.hbm [shape: f32[28996,128], index: 2, kind: input, shape index: {}]   ;;  %s1348_s3 = inlined_call_operand.hbm [shape: f32[128,128], index: 3, kind: input, shape index: {}]   ;;  %s1349_s4 = inlined_call_operand.hbm [shape: f32[1,128], index: 4, kind: input, shape index: {}]   ;;  %s1350_s5 = inlined_call_operand.hbm [shape: f32[1,128], index: 5, kind: input, shape index: {}]   ;;  %s1351_s6 = inlined_call_operand.hbm [shape: f32[256,128], index: 6, kind: output, shape index: {}]   ;;  %s1352_s1 = inlined_call_operand.hbm [shape: s32[256], index: 1, kind: input, shape index: {}]  }
   0x1   :  { %s698_s23 = scalar_lea.hbm %s1346_s0, 32 }
   0x2   :  { %p699_p0 = scmp.ne.s32.totalorder %s1346_s0, %s698_s23  ;;  %p702_p1 = scmp.lt.u32.totalorder %s698_s23, %s1346_s0 }
   0x4   :  { %p704_p2 = pnand %p702_p1, %p699_p0 }
   0x6   :  { %707 = shalt.err (!%p704_p2)  }
   0x7   :  { %s846_s28 = smov [#allocation4]   ;;  %s708_s9 = scalar_lea.hbm %s1352_s1, 32 }
   0x8   :  { %12 = dma.hbm_to_smem %s1346_s0, 32, %s846_s28, [#allocation3] }
   0x9   :  { %p709_p3 = scmp.ne.s32.totalorder %s1352_s1, %s708_s9  ;;  %p712_p4 = scmp.lt.u32.totalorder %s708_s9, %s1352_s1 }
   0xb   :  { %p714_p5 = pnand %p712_p4, %p709_p3 }
   0xd   :  { %717 = shalt.err (!%p714_p5)  }
   0xe   :  { %s847_s14 = smov [#allocation5]  }
   0xf   :  { %14 = dma.hbm_to_smem %s1352_s1, 32, %s847_s14, [#allocation3] }
  0x10   :  { %832 = dma.done.wait [#allocation3], 64 }
  0x11   :  { %833 = vsyncadd [#allocation3], 4294967232 }
  0x12   :  { %16 = sfence }
  0x13   :  { %17 = vsyncpa [#allocation7], 0 }
  0x14   :  { %18 = vsyncpa [#allocation10], 0 }
  0x15   :  { %19 = vsyncpa [#allocation13], 0 }
  0x16   :  { %20 = vsyncpa [#allocation8], 0  ;;  %s848_s0 = smov [#allocation9]   ;;  %s849_s18 = smov [#allocation6]  }
  0x17   :  { %s38_s17 = sshll.u32 %s848_s0, 4  ;;  %s26_s19 = sshll.u32 %s849_s18, 4  ;;  %s39_s17 = int_to_ptr.vmem [resolvable:$true] %s38_s17  ;;  %s914_s19 = int_to_ptr.vmem [resolvable:$true] %s26_s19 }
  0x18   :  { %s718_s22 = scalar_lea.hbm %s1348_s3, 2048 }
  0x19   :  { %p719_p6 = scmp.ne.s32.totalorder %s1348_s3, %s718_s22  ;;  %p722_p7 = scmp.lt.u32.totalorder %s718_s22, %s1348_s3 }
  0x1b   :  { %p724_p8 = pnand %p722_p7, %p719_p6 }
  0x1d   :  { %727 = shalt.err (!%p724_p8)
}
  0x1e   :  { %s728_s26 = scalar_lea.vmem %s39_s17, 2048  ;;  %p733_p10 = scmp.lt.s32.totalorder %s39_s17, %s39_s17 }
  0x1f   :  { %p729_p9 = scmp.ne.s32.totalorder %s39_s17, %s728_s26  ;;  %p734_p11 = scmp.lt.s32.totalorder %s728_s26, %s728_s26 }
  0x21   :  { %p735_p12 = por %p734_p11, %p733_p10 }
  0x23   :  { %p736_p13 = pnand %p735_p12, %p729_p9 }
  0x25   :  { %739 = shalt.err (!%p736_p13)
}
  0x26   :  { %s850_s27 = smov 128   ;;  %s851_s28 = smov 8  }
  0x27   :  { %44 = dma.hbm_to_vmem [thread:$0]  %s1348_s3, 2048, %s39_s17, [#allocation10], %s850_s27, %s850_s27, %s851_s28  }
  0x28   :  { %s740_s9 = scalar_lea.hbm %s1347_s2, 464000 }
  0x29   :  { %p741_p0 = scmp.ne.s32.totalorder %s1347_s2, %s740_s9  ;;  %p744_p1 = scmp.lt.u32.totalorder %s740_s9, %s1347_s2 }
  0x2b   :  { %p746_p2 = pnand %p744_p1, %p741_p0 }
  0x2d   :  { %749 = shalt.err (!%p746_p2)
}
  0x2e   :  { %s750_s14 = scalar_lea.vmem %s914_s19, 464000  ;;  %p755_p4 = scmp.lt.s32.totalorder %s914_s19, %s914_s19 }
  0x2f   :  { %p751_p3 = scmp.ne.s32.totalorder %s914_s19, %s750_s14  ;;  %p756_p5 = scmp.lt.s32.totalorder %s750_s14, %s750_s14 }
  0x31   :  { %p757_p6 = por %p756_p5, %p755_p4 }
  0x33   :  { %p758_p7 = pnand %p757_p6, %p751_p3 }
  0x35   :  { %761 = shalt.err (!%p758_p7)
}
  0x36   :  { %32 = dma.hbm_to_vmem [thread:$0]  %s1347_s2, 464000, %s914_s19, [#allocation7], %s850_s27, %s850_s27, %s851_s28  }
  0x37   :  { %s852_s16 = smov [#allocation11]   ;;  %s853_s17 = smov [#allocation12]  }
  0x38   :  { %s51_s0 = sshll.u32 %s852_s16, 4  ;;  %s61_s18 = sshll.u32 %s853_s17, 4  ;;  %s52_s0 = int_to_ptr.vmem [resolvable:$true] %s51_s0  ;;  %s62_s18 = int_to_ptr.vmem [resolvable:$true] %s61_s18 }
  0x39   :  { %s762_s22 = scalar_lea.hbm %s1349_s4, 16 }
  0x3a   :  { %p763_p8 = scmp.ne.s32.totalorder %s1349_s4, %s762_s22  ;;  %p766_p9 = scmp.lt.u32.totalorder %s762_s22, %s1349_s4 }
  0x3c   :  { %p768_p10 = pnand %p766_p9, %p763_p8 }
  0x3e   :  { %771 = shalt.err (!%p768_p10)
}
  0x3f   :  { %s772_s2 = scalar_lea.vmem %s52_s0, 16  ;;  %s776_s19 = scalar_lea.vmem %s52_s0, 32 }
  0x40   :  { %p773_p11 = scmp.ne.s32.totalorder %s52_s0, %s772_s2  ;;  %p777_p12 = scmp.lt.s32.totalorder %s52_s0, %s52_s0 }
  0x41   :  { %p778_p13 = scmp.lt.s32.totalorder %s776_s19, %s772_s2 }
  0x43   :  { %p779_p0 = por %p778_p13, %p777_p12 }
  0x45   :  { %p780_p1 = pnand %p779_p0, %p773_p11 }
  0x47   :  { %783 = shalt.err (!%p780_p1)
}
  0x48   :  { %54 = dma.hbm_to_vmem [thread:$0]  %s1349_s4, 16, %s52_s0, [#allocation10]  }
  0x49   :  { %s784_s8 = scalar_lea.hbm %s1350_s5, 16 }
  0x4a   :  { %p785_p2 = scmp.ne.s32.totalorder %s1350_s5, %s784_s8  ;;  %p788_p3 = scmp.lt.u32.totalorder %s784_s8, %s1350_s5 }
  0x4c   :  { %p790_p4 = pnand %p788_p3, %p785_p2 }
  0x4e   :  { %793 = shalt.err (!%p790_p4)
}
  0x4f   :  { %s794_s13 = scalar_lea.vmem %s62_s18, 16  ;;  %s798_s14 = scalar_lea.vmem %s62_s18, 32 }
  0x50   :  { %p795_p5 = scmp.ne.s32.totalorder %s62_s18, %s794_s13  ;;  %p799_p6 = scmp.lt.s32.totalorder %s62_s18, %s62_s18 }
  0x51   :  { %p800_p7 = scmp.lt.s32.totalorder %s798_s14, %s794_s13 }
  0x53   :  { %p801_p8 = por %p800_p7, %p799_p6 }
  0x55   :  { %p802_p9 = pnand %p801_p8, %p795_p5 }
  0x57   :  { %805 = shalt.err (!%p802_p9)
}
  0x58   :  { %64 = dma.hbm_to_vmem [thread:$0]  %s1350_s5, 16, %s62_s18, [#allocation13]  }
  0x59   :  { %834 = dma.done.wait [#allocation7], 464000  }
  0x5a   :  { %835 = vsyncadd [#allocation7], 4294503296 }
  0x5b   :  { %836 = dma.done.wait [#allocation10], 2064  }
  0x5c   :  { %837 = vsyncadd [#allocation10], 4294965232 }
  0x5d   :  { %838 = dma.done.wait [#allocation13], 16  }
  0x5e   :  { %839 = vsyncadd [#allocation13], 4294967280  ;;  %s842_s15 = smov 0  }
  0x5f LB: > { %s85_s16 = sld [smem:[#allocation4 + %s844_s15]]  ;;  %s92_s21 = scalar_lea.vmem [#allocation2], %s844_s15  ;;  %s844_s15 = sphi %s842_s15, %s83_s15  }
  0x60   : > { %s86_s0 = sld [smem:[#allocation5 + %s844_s15]]  ;;  %s83_s15 = sadd.s32 1, %s844_s15  }
  0x61   : > { %p80_p10 = scmp.ge.s32.totalorder %s83_s15, 256  }
  0x62   :  { %s854_s5 = smov (%p80_p10), [#allocation14]  }
  0x63   :  { %s593_s18 = sshll.u32 (%p80_p10), %s854_s5, 4  ;;  %s594_s18 = int_to_ptr.vmem [resolvable:$true] %s593_s18 }
  0x64   :  { %82 = sbr.rel (!%p80_p10) target bundleno = 95 (0x5f), region = 62  ;;  %s806_s22 = scalar_lea.vmem (%p80_p10), %s594_s18, 4096 }
  0x65   : > { %s87_s17 = scalar_lea.vmem [#allocation6], %s85_s16  ;;  %p807_p11 = scmp.ne.s32.totalorder (%p80_p10), %s594_s18, %s806_s22 }
  0x66   : > { %v88_v0 = vld [vmem:[%s87_s17] sm:$0x1]  ;;  %s89_s20 = scalar_lea.vmem [#allocation9], %s86_s0  ;;  %p811_p12 = scmp.lt.s32.totalorder (%p80_p10), %s594_s18, %s594_s18 }
  0x67   : > { %v90_v1 = vld [vmem:[%s89_s20] sm:$0x1]  ;;  %p812_p13 = scmp.lt.s32.totalorder (%p80_p10), %s806_s22, %s806_s22 }
  0x68   : > { %v91_v2 = vadd.f32 %v90_v1, %v88_v0 }
  0x69   :  { %p813_p0 = por (%p80_p10), %p812_p13, %p811_p12 }
  0x6a   : > { %93 = vst [vmem:[%s92_s21] sm:$0x1] %v91_v2 }
  0x6b   :  { %p814_p1 = pnand %p813_p0, %p807_p11 }
  0x71   :  { %v975_v3 = vld [vmem:[#allocation2] sm:$0xff]  ;;  %v977_v4 = vld [vmem:[#allocation2 + $0x10] sm:$0xff]  ;;  %v981_v5 = vld [vmem:[#allocation2 + $0x8] sm:$0xff] }
  0x72   :  { %126 = vadd.xlane.f32.xlu0 %v975_v3  ;;  %130 = vadd.xlane.f32.xlu1 %v977_v4  ;;  %v983_v6 = vld [vmem:[#allocation2 + $0x18] sm:$0xff]  ;;  %v987_v7 = vld [vmem:[#allocation2 + $0x20] sm:$0xff]  ;;  %v989_v8 = vld [vmem:[#allocation2 + $0x28] sm:$0xff] }
  0x73   :  { %v993_v9 = vld [vmem:[#allocation2 + $0x30] sm:$0xff]  ;;  %v995_v10 = vld [vmem:[#allocation2 + $0x38] sm:$0xff]  ;;  %v999_v11 = vld [vmem:[#allocation2 + $0x40] sm:$0xff] }
  0x74   :  { %v1001_v12 = vld [vmem:[#allocation2 + $0x48] sm:$0xff]  ;;  %v1005_v13 = vld [vmem:[#allocation2 + $0x50] sm:$0xff]  ;;  %v1007_v14 = vld [vmem:[#allocation2 + $0x58] sm:$0xff] }
  0x75   :  { %v1011_v15 = vld [vmem:[#allocation2 + $0x60] sm:$0xff]  ;;  %v1013_v16 = vld [vmem:[#allocation2 + $0x68] sm:$0xff]  ;;  %v1017_v17 = vld [vmem:[#allocation2 + $0x70] sm:$0xff] }
  0x76   :  { %128 = vadd.xlane.f32.xlu0 %v981_v5  ;;  %132 = vadd.xlane.f32.xlu1 %v983_v6  ;;  %v1019_v18 = vld [vmem:[#allocation2 + $0x78] sm:$0xff]  ;;  %v1023_v19 = vld [vmem:[#allocation2 + $0x80] sm:$0xff]  ;;  %v1025_v20 = vld [vmem:[#allocation2 + $0x88] sm:$0xff] }
  0x77   :  { %v1029_v21 = vld [vmem:[#allocation2 + $0x90] sm:$0xff]  ;;  %v1031_v22 = vld [vmem:[#allocation2 + $0x98] sm:$0xff]  ;;  %v1035_v23 = vld [vmem:[#allocation2 + $0xa0] sm:$0xff] }
  0x78   :  { %v1037_v24 = vld [vmem:[#allocation2 + $0xa8] sm:$0xff]  ;;  %v1041_v25 = vld [vmem:[#allocation2 + $0xb0] sm:$0xff]  ;;  %v1043_v26 = vld [vmem:[#allocation2 + $0xb8] sm:$0xff] }
  0x79   :  { %v1047_v27 = vld [vmem:[#allocation2 + $0xc0] sm:$0xff]  ;;  %v1049_v28 = vld [vmem:[#allocation2 + $0xc8] sm:$0xff]  ;;  %v1053_v29 = vld [vmem:[#allocation2 + $0xd0] sm:$0xff] }
  0x7a   :  { %134 = vadd.xlane.f32.xlu0 %v987_v7  ;;  %136 = vadd.xlane.f32.xlu1 %v989_v8  ;;  %v1055_v30 = vld [vmem:[#allocation2 + $0xd8] sm:$0xff]  ;;  %v1059_v31 = vld [vmem:[#allocation2 + $0xe0] sm:$0xff]  ;;  %v1061_v32 = vld [vmem:[#allocation2 + $0xe8] sm:$0xff] }
  0x7b   :  { %v1065_v33 = vld [vmem:[#allocation2 + $0xf0] sm:$0xff]  ;;  %v1067_v34 = vld [vmem:[#allocation2 + $0xf8] sm:$0xff] }
  0x7e   :  { %138 = vadd.xlane.f32.xlu0 %v993_v9  ;;  %140 = vadd.xlane.f32.xlu1 %v995_v10 }
  0x82   :  { %142 = vadd.xlane.f32.xlu0 %v999_v11  ;;  %144 = vadd.xlane.f32.xlu1 %v1001_v12 }
  0x86   :  { %146 = vadd.xlane.f32.xlu0 %v1005_v13  ;;  %148 = vadd.xlane.f32.xlu1 %v1007_v14 }
  0x8a   :  { %150 = vadd.xlane.f32.xlu0 %v1011_v15  ;;  %152 = vadd.xlane.f32.xlu1 %v1013_v16 }
  0x8e   :  { %154 = vadd.xlane.f32.xlu0 %v1017_v17  ;;  %156 = vadd.xlane.f32.xlu1 %v1019_v18 }
  0x92   :  { %158 = vadd.xlane.f32.xlu0 %v1023_v19  ;;  %160 = vadd.xlane.f32.xlu1 %v1025_v20 }
  0x96   :  { %162 = vadd.xlane.f32.xlu0 %v1029_v21  ;;  %164 = vadd.xlane.f32.xlu1 %v1031_v22 }
  0x9a   :  { %166 = vadd.xlane.f32.xlu0 %v1035_v23  ;;  %168 = vadd.xlane.f32.xlu1 %v1037_v24 }
  0x9e   :  { %170 = vadd.xlane.f32.xlu0 %v1041_v25  ;;  %172 = vadd.xlane.f32.xlu1 %v1043_v26 }
  0xa2   :  { %174 = vadd.xlane.f32.xlu0 %v1047_v27  ;;  %176 = vadd.xlane.f32.xlu1 %v1049_v28 }
  0xa6   :  { %178 = vadd.xlane.f32.xlu0 %v1053_v29  ;;  %180 = vadd.xlane.f32.xlu1 %v1055_v30 }
  0xaa   :  { %182 = vadd.xlane.f32.xlu0 %v1059_v31  ;;  %184 = vadd.xlane.f32.xlu1 %v1061_v32 }
  0xae   :  { %186 = vadd.xlane.f32.xlu0 %v1065_v33  ;;  %188 = vadd.xlane.f32.xlu1 %v1067_v34 }
  0xff   :  { %v127_v35 = vpop.xlane.xlu0 %126  ;;  %v131_v36 = vpop.xlane.xlu1 %130 }
 0x100   :  { %v190_v37 = vmul.f32 0.0078125, %v127_v35  ;;  %v192_v38 = vmul.f32 0.0078125, %v131_v36 }
 0x102   :  { %v1072_v39 = vsub.f32 %v975_v3, %v190_v37  ;;  %v1075_v40 = vsub.f32 %v977_v4, %v192_v38 }
 0x103   :  { %v129_v41 = vpop.xlane.xlu0 %128  ;;  %v133_v42 = vpop.xlane.xlu1 %132 }
 0x104   :  { %v191_v43 = vmul.f32 0.0078125, %v129_v41  ;;  %v254_v44 = vmul.f32 %v1072_v39, %v1072_v39  ;;  %v193_v45 = vmul.f32 0.0078125, %v133_v42  ;;  %v256_v48 = vmul.f32 %v1075_v40, %v1075_v40 }
 0x106   :  { %v1080_v46 = vsub.f32 %v981_v5, %v191_v43  ;;  %286 = vadd.xlane.f32.xlu0 %v254_v44  ;;  %v1083_v47 = vsub.f32 %v983_v6, %v193_v45 }
 0x107   :  { %v135_v49 = vpop.xlane.xlu0 %134  ;;  %v137_v50 = vpop.xlane.xlu1 %136 }
 0x108   :  { %v194_v51 = vmul.f32 0.0078125, %v135_v49  ;;  %v255_v52 = vmul.f32 %v1080_v46, %v1080_v46  ;;  %v195_v53 = vmul.f32 0.0078125, %v137_v50  ;;  %v257_v56 = vmul.f32 %v1083_v47, %v1083_v47 }
 0x10a   :  { %v1090_v54 = vsub.f32 %v987_v7, %v194_v51  ;;  %290 = vadd.xlane.f32.xlu0 %v256_v48  ;;  %288 = vadd.xlane.f32.xlu1 %v255_v52  ;;  %v1093_v55 = vsub.f32 %v989_v8, %v195_v53 }
 0x10b   :  { %v139_v57 = vpop.xlane.xlu0 %138  ;;  %v141_v58 = vpop.xlane.xlu1 %140 }
 0x10c   :  { %v196_v59 = vmul.f32 0.0078125, %v139_v57  ;;  %v258_v60 = vmul.f32 %v1090_v54, %v1090_v54  ;;  %v197_v61 = vmul.f32 0.0078125, %v141_v58  ;;  %v259_v0 = vmul.f32 %v1093_v55, %v1093_v55 }
 0x10e   :  { %v1100_v62 = vsub.f32 %v993_v9, %v196_v59  ;;  %292 = vadd.xlane.f32.xlu1 %v257_v56  ;;  %294 = vadd.xlane.f32.xlu0 %v258_v60  ;;  %v1103_v63 = vsub.f32 %v995_v10, %v197_v61 }
 0x10f   :  { %v143_v1 = vpop.xlane.xlu0 %142  ;;  %v145_v2 = vpop.xlane.xlu1 %144 }
 0x110   :  { %v198_v3 = vmul.f32 0.0078125, %v143_v1  ;;  %v260_v4 = vmul.f32 %v1100_v62, %v1100_v62  ;;  %v199_v5 = vmul.f32 0.0078125, %v145_v2  ;;  %v261_v8 = vmul.f32 %v1103_v63, %v1103_v63 }
 0x112   :  { %v1110_v6 = vsub.f32 %v999_v11, %v198_v3  ;;  %296 = vadd.xlane.f32.xlu1 %v259_v0  ;;  %298 = vadd.xlane.f32.xlu0 %v260_v4  ;;  %v1113_v7 = vsub.f32 %v1001_v12, %v199_v5 }
 0x113   :  { %v147_v9 = vpop.xlane.xlu0 %146  ;;  %v149_v10 = vpop.xlane.xlu1 %148 }
 0x114   :  { %v200_v35 = vmul.f32 0.0078125, %v147_v9  ;;  %v262_v36 = vmul.f32 %v1110_v6, %v1110_v6  ;;  %v201_v37 = vmul.f32 0.0078125, %v149_v10  ;;  %v263_v12 = vmul.f32 %v1113_v7, %v1113_v7 }
 0x116   :  { %v1120_v38 = vsub.f32 %v1005_v13, %v200_v35  ;;  %300 = vadd.xlane.f32.xlu1 %v261_v8  ;;  %302 = vadd.xlane.f32.xlu0 %v262_v36  ;;  %v1123_v11 = vsub.f32 %v1007_v14, %v201_v37 }
 0x117   :  { %v151_v41 = vpop.xlane.xlu0 %150  ;;  %v153_v42 = vpop.xlane.xlu1 %152 }
 0x118   :  { %v202_v43 = vmul.f32 0.0078125, %v151_v41  ;;  %v264_v44 = vmul.f32 %v1120_v38, %v1120_v38  ;;  %v203_v45 = vmul.f32 0.0078125, %v153_v42  ;;  %v265_v14 = vmul.f32 %v1123_v11, %v1123_v11 }
 0x11a   :  { %v1130_v48 = vsub.f32 %v1011_v15, %v202_v43  ;;  %304 = vadd.xlane.f32.xlu1 %v263_v12  ;;  %306 = vadd.xlane.f32.xlu0 %v264_v44  ;;  %v1133_v13 = vsub.f32 %v1013_v16, %v203_v45 }
 0x11b   :  { %v155_v49 = vpop.xlane.xlu0 %154  ;;  %v157_v50 = vpop.xlane.xlu1 %156 }
 0x11c   :  { %v204_v51 = vmul.f32 0.0078125, %v155_v49  ;;  %v266_v52 = vmul.f32 %v1130_v48, %v1130_v48  ;;  %v205_v53 = vmul.f32 0.0078125, %v157_v50  ;;  %v267_v16 = vmul.f32 %v1133_v13, %v1133_v13 }
 0x11e   :  { %v1140_v56 = vsub.f32 %v1017_v17, %v204_v51  ;;  %308 = vadd.xlane.f32.xlu1 %v265_v14  ;;  %310 = vadd.xlane.f32.xlu0 %v266_v52  ;;  %v1143_v15 = vsub.f32 %v1019_v18, %v205_v53 }
 0x11f   :  { %v159_v57 = vpop.xlane.xlu0 %158  ;;  %v161_v58 = vpop.xlane.xlu1 %160 }
 0x120   :  { %v206_v59 = vmul.f32 0.0078125, %v159_v57  ;;  %v268_v60 = vmul.f32 %v1140_v56, %v1140_v56  ;;  %v207_v61 = vmul.f32 0.0078125, %v161_v58  ;;  %v269_v18 = vmul.f32 %v1143_v15, %v1143_v15 }
 0x122   :  { %v1150_v0 = vsub.f32 %v1023_v19, %v206_v59  ;;  %312 = vadd.xlane.f32.xlu1 %v267_v16  ;;  %314 = vadd.xlane.f32.xlu0 %v268_v60  ;;  %v1153_v17 = vsub.f32 %v1025_v20, %v207_v61 }
 0x123   :  { %v163_v1 = vpop.xlane.xlu0 %162  ;;  %v165_v2 = vpop.xlane.xlu1 %164 }
 0x124   :  { %v208_v3 = vmul.f32 0.0078125, %v163_v1  ;;  %v270_v4 = vmul.f32 %v1150_v0, %v1150_v0  ;;  %v209_v5 = vmul.f32 0.0078125, %v165_v2  ;;  %v271_v20 = vmul.f32 %v1153_v17, %v1153_v17 }
 0x126   :  { %v1160_v8 = vsub.f32 %v1029_v21, %v208_v3  ;;  %316 = vadd.xlane.f32.xlu1 %v269_v18  ;;  %318 = vadd.xlane.f32.xlu0 %v270_v4  ;;  %v1163_v19 = vsub.f32 %v1031_v22, %v209_v5 }
 0x127   :  { %v167_v9 = vpop.xlane.xlu0 %166  ;;  %v169_v10 = vpop.xlane.xlu1 %168 }
 0x128   :  { %v210_v35 = vmul.f32 0.0078125, %v167_v9  ;;  %v272_v36 = vmul.f32 %v1160_v8, %v1160_v8  ;;  %v211_v37 = vmul.f32 0.0078125, %v169_v10  ;;  %v273_v22 = vmul.f32 %v1163_v19, %v1163_v19 }
 0x12a   :  { %v1170_v12 = vsub.f32 %v1035_v23, %v210_v35  ;;  %320 = vadd.xlane.f32.xlu1 %v271_v20  ;;  %322 = vadd.xlane.f32.xlu0 %v272_v36  ;;  %v1173_v21 = vsub.f32 %v1037_v24, %v211_v37 }
 0x12b   :  { %v171_v41 = vpop.xlane.xlu0 %170  ;;  %v173_v42 = vpop.xlane.xlu1 %172 }
 0x12c   :  { %v212_v43 = vmul.f32 0.0078125, %v171_v41  ;;  %v274_v44 = vmul.f32 %v1170_v12, %v1170_v12  ;;  %v213_v45 = vmul.f32 0.0078125, %v173_v42  ;;  %v275_v24 = vmul.f32 %v1173_v21, %v1173_v21 }
 0x12e   :  { %v1180_v14 = vsub.f32 %v1041_v25, %v212_v43  ;;  %324 = vadd.xlane.f32.xlu1 %v273_v22  ;;  %326 = vadd.xlane.f32.xlu0 %v274_v44  ;;  %v1183_v23 = vsub.f32 %v1043_v26, %v213_v45 }
 0x12f   :  { %v175_v49 = vpop.xlane.xlu0 %174  ;;  %v177_v50 = vpop.xlane.xlu1 %176 }
 0x130   :  { %v214_v51 = vmul.f32 0.0078125, %v175_v49  ;;  %v276_v52 = vmul.f32 %v1180_v14, %v1180_v14  ;;  %v215_v53 = vmul.f32 0.0078125, %v177_v50  ;;  %v277_v26 = vmul.f32 %v1183_v23, %v1183_v23 }
 0x132   :  { %v1190_v16 = vsub.f32 %v1047_v27, %v214_v51  ;;  %328 = vadd.xlane.f32.xlu1 %v275_v24  ;;  %330 = vadd.xlane.f32.xlu0 %v276_v52  ;;  %v1193_v25 = vsub.f32 %v1049_v28, %v215_v53 }
 0x133   :  { %v179_v57 = vpop.xlane.xlu0 %178  ;;  %v181_v58 = vpop.xlane.xlu1 %180 }
 0x134   :  { %v216_v59 = vmul.f32 0.0078125, %v179_v57  ;;  %v278_v60 = vmul.f32 %v1190_v16, %v1190_v16  ;;  %v217_v61 = vmul.f32 0.0078125, %v181_v58  ;;  %v279_v28 = vmul.f32 %v1193_v25, %v1193_v25 }
 0x136   :  { %v1200_v18 = vsub.f32 %v1053_v29, %v216_v59  ;;  %332 = vadd.xlane.f32.xlu1 %v277_v26  ;;  %334 = vadd.xlane.f32.xlu0 %v278_v60  ;;  %v1203_v27 = vsub.f32 %v1055_v30, %v217_v61 }
 0x137   :  { %v183_v1 = vpop.xlane.xlu0 %182  ;;  %v185_v2 = vpop.xlane.xlu1 %184 }
 0x138   :  { %v218_v3 = vmul.f32 0.0078125, %v183_v1  ;;  %v280_v4 = vmul.f32 %v1200_v18, %v1200_v18  ;;  %v219_v5 = vmul.f32 0.0078125, %v185_v2  ;;  %v281_v30 = vmul.f32 %v1203_v27, %v1203_v27 }
 0x13a   :  { %v1210_v20 = vsub.f32 %v1059_v31, %v218_v3  ;;  %336 = vadd.xlane.f32.xlu1 %v279_v28  ;;  %338 = vadd.xlane.f32.xlu0 %v280_v4  ;;  %v1213_v29 = vsub.f32 %v1061_v32, %v219_v5  ;;  %v1231_v28 = vld [vmem:[#allocation11] ss:$0 sm:$0xff] }
 0x13b   :  { %v187_v9 = vpop.xlane.xlu0 %186  ;;  %v189_v10 = vpop.xlane.xlu1 %188 }
 0x13c   :  { %v220_v35 = vmul.f32 0.0078125, %v187_v9  ;;  %v282_v36 = vmul.f32 %v1210_v20, %v1210_v20  ;;  %v221_v37 = vmul.f32 0.0078125, %v189_v10  ;;  %v283_v32 = vmul.f32 %v1213_v29, %v1213_v29 }
 0x13e   :  { %v1220_v22 = vsub.f32 %v1065_v33, %v220_v35  ;;  %340 = vadd.xlane.f32.xlu1 %v281_v30  ;;  %342 = vadd.xlane.f32.xlu0 %v282_v36  ;;  %v1223_v31 = vsub.f32 %v1067_v34, %v221_v37  ;;  %v1234_v35 = vld [vmem:[#allocation12] ss:$0 sm:$0xff] }
 0x140   :  { %v284_v41 = vmul.f32 %v1220_v22, %v1220_v22  ;;  %v285_v42 = vmul.f32 %v1223_v31, %v1223_v31 }
 0x142   :  { %344 = vadd.xlane.f32.xlu1 %v283_v32  ;;  %346 = vadd.xlane.f32.xlu0 %v284_v41 }
 0x146   :  { %348 = vadd.xlane.f32.xlu1 %v285_v42 }
 0x193   :  { %v287_v43 = vpop.xlane.xlu0 %286 }
 0x194   :  { %v350_v33 = vmul.f32 0.0078125, %v287_v43 }
 0x196   :  { %v382_v44 = vadd.f32 1e-12, %v350_v33 }
 0x197   :  { %v289_v45 = vpop.xlane.xlu1 %288  ;;  %v291_v24 = vpop.xlane.xlu0 %290 }
 0x198   :  { %634 = vrsqrt.f32 %v382_v44  ;;  %v351_v34 = vmul.f32 0.0078125, %v289_v45  ;;  %v352_v49 = vmul.f32 0.0078125, %v291_v24 }
 0x19a   :  { %v383_v50 = vadd.f32 1e-12, %v351_v34  ;;  %v384_v51 = vadd.f32 1e-12, %v352_v49 }
 0x19b   :  { %v293_v52 = vpop.xlane.xlu1 %292  ;;  %v295_v53 = vpop.xlane.xlu0 %294 }
 0x19c   :  { %636 = vrsqrt.f32 %v383_v50  ;;  %v353_v26 = vmul.f32 0.0078125, %v293_v52  ;;  %v354_v57 = vmul.f32 0.0078125, %v295_v53 }
 0x19d   :  { %638 = vrsqrt.f32 %v384_v51 }
 0x19e   :  { %v385_v58 = vadd.f32 1e-12, %v353_v26  ;;  %v386_v59 = vadd.f32 1e-12, %v354_v57 }
 0x19f   :  { %v297_v60 = vpop.xlane.xlu1 %296  ;;  %v299_v61 = vpop.xlane.xlu0 %298 }
 0x1a0   :  { %640 = vrsqrt.f32 %v385_v58  ;;  %v355_v1 = vmul.f32 0.0078125, %v297_v60  ;;  %v356_v2 = vmul.f32 0.0078125, %v299_v61 }
 0x1a1   :  { %642 = vrsqrt.f32 %v386_v59 }
 0x1a2   :  { %v635_v3 = vpop.eup %634  ;;  %v387_v4 = vadd.f32 1e-12, %v355_v1  ;;  %v388_v5 = vadd.f32 1e-12, %v356_v2 }
 0x1a3   :  { %v453_v30 = vmul.f32 %v635_v3, %v1231_v28  ;;  %v301_v9 = vpop.xlane.xlu1 %300  ;;  %v303_v10 = vpop.xlane.xlu0 %302 }
 0x1a4   :  { %644 = vrsqrt.f32 %v387_v4  ;;  %v357_v36 = vmul.f32 0.0078125, %v301_v9  ;;  %v358_v37 = vmul.f32 0.0078125, %v303_v10 }
 0x1a5   :  { %v485_v32 = vmul.f32 %v453_v30, %v1072_v39  ;;  %646 = vrsqrt.f32 %v388_v5 }
 0x1a6   :  { %v637_v41 = vpop.eup %636  ;;  %v389_v42 = vadd.f32 1e-12, %v357_v36  ;;  %v390_v43 = vadd.f32 1e-12, %v358_v37 }
 0x1a7   :  { %v639_v33 = vpop.eup %638  ;;  %v524_v44 = vadd.f32 %v1234_v35, %v485_v32  ;;  %v454_v45 = vmul.f32 %v637_v41, %v1231_v28  ;;  %v305_v24 = vpop.xlane.xlu1 %304 }
 0x1a8   :  { %v307_v34 = vpop.xlane.xlu0 %306  ;;  %v455_v49 = vmul.f32 %v639_v33, %v1231_v28  ;;  %648 = vrsqrt.f32 %v389_v42  ;;  %v359_v50 = vmul.f32 0.0078125, %v305_v24 }
 0x1a9   :  { %v360_v51 = vmul.f32 0.0078125, %v307_v34  ;;  %556 = vst [vmem:[#allocation14] sm:$0xff] %v524_v44  ;;  %v486_v52 = vmul.f32 %v454_v45, %v1080_v46  ;;  %650 = vrsqrt.f32 %v390_v43 }
 0x1aa   :  { %v641_v39 = vpop.eup %640  ;;  %v487_v53 = vmul.f32 %v455_v49, %v1075_v40  ;;  %v391_v26 = vadd.f32 1e-12, %v359_v50 }
 0x1ab   :  { %v392_v57 = vadd.f32 1e-12, %v360_v51  ;;  %v643_v58 = vpop.eup %642  ;;  %v525_v59 = vadd.f32 %v1234_v35, %v486_v52  ;;  %v456_v60 = vmul.f32 %v641_v39, %v1231_v28  ;;  %v309_v61 = vpop.xlane.xlu1 %308 }
 0x1ac   :  { %v311_v1 = vpop.xlane.xlu0 %310  ;;  %v526_v2 = vadd.f32 %v1234_v35, %v487_v53  ;;  %v457_v3 = vmul.f32 %v643_v58, %v1231_v28  ;;  %652 = vrsqrt.f32 %v391_v26  ;;  %v361_v4 = vmul.f32 0.0078125, %v309_v61 }
 0x1ad   :  { %557 = vst [vmem:[#allocation14 + $0x8] sm:$0xff] %v525_v59  ;;  %v488_v46 = vmul.f32 %v456_v60, %v1083_v47  ;;  %654 = vrsqrt.f32 %v392_v57  ;;  %v362_v40 = vmul.f32 0.0078125, %v311_v1 }
 0x1ae   :  { %v645_v5 = vpop.eup %644  ;;  %558 = vst [vmem:[#allocation14 + $0x10] sm:$0xff] %v526_v2  ;;  %v489_v30 = vmul.f32 %v457_v3, %v1090_v54  ;;  %v393_v9 = vadd.f32 1e-12, %v361_v4 }
 0x1af   :  { %v647_v10 = vpop.eup %646  ;;  %v527_v36 = vadd.f32 %v1234_v35, %v488_v46  ;;  %v458_v37 = vmul.f32 %v645_v5, %v1231_v28  ;;  %v394_v32 = vadd.f32 1e-12, %v362_v40  ;;  %v313_v41 = vpop.xlane.xlu1 %312 }
 0x1b0   :  { %v315_v42 = vpop.xlane.xlu0 %314  ;;  %v528_v43 = vadd.f32 %v1234_v35, %v489_v30  ;;  %v459_v33 = vmul.f32 %v647_v10, %v1231_v28  ;;  %656 = vrsqrt.f32 %v393_v9  ;;  %v363_v47 = vmul.f32 0.0078125, %v313_v41 }
 0x1b1   :  { %559 = vst [vmem:[#allocation14 + $0x18] sm:$0xff] %v527_v36  ;;  %v490_v44 = vmul.f32 %v458_v37, %v1093_v55  ;;  %658 = vrsqrt.f32 %v394_v32  ;;  %v364_v54 = vmul.f32 0.0078125, %v315_v42 }
 0x1b2   :  { %v649_v45 = vpop.eup %648  ;;  %560 = vst [vmem:[#allocation14 + $0x20] sm:$0xff] %v528_v43  ;;  %v491_v24 = vmul.f32 %v459_v33, %v1100_v62  ;;  %v395_v34 = vadd.f32 1e-12, %v363_v47 }
 0x1b3   :  { %v651_v49 = vpop.eup %650  ;;  %v529_v50 = vadd.f32 %v1234_v35, %v490_v44  ;;  %v460_v51 = vmul.f32 %v649_v45, %v1231_v28  ;;  %v396_v52 = vadd.f32 1e-12, %v364_v54  ;;  %v317_v39 = vpop.xlane.xlu1 %316 }
 0x1b4   :  { %v319_v53 = vpop.xlane.xlu0 %318  ;;  %v530_v26 = vadd.f32 %v1234_v35, %v491_v24  ;;  %v461_v57 = vmul.f32 %v651_v49, %v1231_v28  ;;  %660 = vrsqrt.f32 %v395_v34  ;;  %v365_v55 = vmul.f32 0.0078125, %v317_v39 }
 0x1b5   :  { %561 = vst [vmem:[#allocation14 + $0x28] sm:$0xff] %v529_v50  ;;  %v492_v58 = vmul.f32 %v460_v51, %v1103_v63  ;;  %662 = vrsqrt.f32 %v396_v52  ;;  %v366_v62 = vmul.f32 0.0078125, %v319_v53 }
 0x1b6   :  { %v653_v59 = vpop.eup %652  ;;  %562 = vst [vmem:[#allocation14 + $0x30] sm:$0xff] %v530_v26  ;;  %v493_v60 = vmul.f32 %v461_v57, %v1110_v6  ;;  %v397_v61 = vadd.f32 1e-12, %v365_v55 }
 0x1b7   :  { %v655_v1 = vpop.eup %654  ;;  %v531_v2 = vadd.f32 %v1234_v35, %v492_v58  ;;  %v462_v3 = vmul.f32 %v653_v59, %v1231_v28  ;;  %v398_v4 = vadd.f32 1e-12, %v366_v62  ;;  %v321_v46 = vpop.xlane.xlu1 %320 }
 0x1b8   :  { %v323_v40 = vpop.xlane.xlu0 %322  ;;  %v532_v5 = vadd.f32 %v1234_v35, %v493_v60  ;;  %v463_v30 = vmul.f32 %v655_v1, %v1231_v28  ;;  %664 = vrsqrt.f32 %v397_v61  ;;  %v367_v63 = vmul.f32 0.0078125, %v321_v46 }
 0x1b9   :  { %563 = vst [vmem:[#allocation14 + $0x38] sm:$0xff] %v531_v2  ;;  %v494_v9 = vmul.f32 %v462_v3, %v1113_v7  ;;  %666 = vrsqrt.f32 %v398_v4  ;;  %v368_v6 = vmul.f32 0.0078125, %v323_v40 }
 0x1ba   :  { %v657_v10 = vpop.eup %656  ;;  %564 = vst [vmem:[#allocation14 + $0x40] sm:$0xff] %v532_v5  ;;  %v495_v36 = vmul.f32 %v463_v30, %v1120_v38  ;;  %v399_v37 = vadd.f32 1e-12, %v367_v63 }
 0x1bb   :  { %v659_v32 = vpop.eup %658  ;;  %v533_v41 = vadd.f32 %v1234_v35, %v494_v9  ;;  %v464_v42 = vmul.f32 %v657_v10, %v1231_v28  ;;  %v400_v43 = vadd.f32 1e-12, %v368_v6  ;;  %v325_v33 = vpop.xlane.xlu1 %324 }
 0x1bc   :  { %v327_v47 = vpop.xlane.xlu0 %326  ;;  %v534_v44 = vadd.f32 %v1234_v35, %v495_v36  ;;  %v465_v54 = vmul.f32 %v659_v32, %v1231_v28  ;;  %668 = vrsqrt.f32 %v399_v37  ;;  %v369_v7 = vmul.f32 0.0078125, %v325_v33 }
 0x1bd   :  { %565 = vst [vmem:[#allocation14 + $0x48] sm:$0xff] %v533_v41  ;;  %v496_v45 = vmul.f32 %v464_v42, %v1123_v11  ;;  %670 = vrsqrt.f32 %v400_v43  ;;  %v370_v38 = vmul.f32 0.0078125, %v327_v47 }
 0x1be   :  { %v661_v24 = vpop.eup %660  ;;  %566 = vst [vmem:[#allocation14 + $0x50] sm:$0xff] %v534_v44  ;;  %v497_v34 = vmul.f32 %v465_v54, %v1130_v48  ;;  %v401_v49 = vadd.f32 1e-12, %v369_v7 }
 0x1bf   :  { %v663_v50 = vpop.eup %662  ;;  %v535_v51 = vadd.f32 %v1234_v35, %v496_v45  ;;  %v466_v52 = vmul.f32 %v661_v24, %v1231_v28  ;;  %v402_v39 = vadd.f32 1e-12, %v370_v38  ;;  %v329_v53 = vpop.xlane.xlu1 %328 }
 0x1c0   :  { %v331_v26 = vpop.xlane.xlu0 %330  ;;  %v536_v57 = vadd.f32 %v1234_v35, %v497_v34  ;;  %v467_v55 = vmul.f32 %v663_v50, %v1231_v28  ;;  %672 = vrsqrt.f32 %v401_v49  ;;  %v371_v11 = vmul.f32 0.0078125, %v329_v53 }
 0x1c1   :  { %567 = vst [vmem:[#allocation14 + $0x58] sm:$0xff] %v535_v51  ;;  %v498_v58 = vmul.f32 %v466_v52, %v1133_v13  ;;  %674 = vrsqrt.f32 %v402_v39  ;;  %v372_v48 = vmul.f32 0.0078125, %v331_v26 }
 0x1c2   :  { %v665_v62 = vpop.eup %664  ;;  %568 = vst [vmem:[#allocation14 + $0x60] sm:$0xff] %v536_v57  ;;  %v499_v59 = vmul.f32 %v467_v55, %v1140_v56  ;;  %v403_v60 = vadd.f32 1e-12, %v371_v11 }
 0x1c3   :  { %v667_v61 = vpop.eup %666  ;;  %v537_v1 = vadd.f32 %v1234_v35, %v498_v58  ;;  %v468_v2 = vmul.f32 %v665_v62, %v1231_v28  ;;  %v404_v3 = vadd.f32 1e-12, %v372_v48  ;;  %v333_v4 = vpop.xlane.xlu1 %332 }
 0x1c4   :  { %v335_v46 = vpop.xlane.xlu0 %334  ;;  %v538_v40 = vadd.f32 %v1234_v35, %v499_v59  ;;  %v469_v5 = vmul.f32 %v667_v61, %v1231_v28  ;;  %676 = vrsqrt.f32 %v403_v60  ;;  %v373_v13 = vmul.f32 0.0078125, %v333_v4 }
 0x1c5   :  { %569 = vst [vmem:[#allocation14 + $0x68] sm:$0xff] %v537_v1  ;;  %v500_v30 = vmul.f32 %v468_v2, %v1143_v15  ;;  %678 = vrsqrt.f32 %v404_v3  ;;  %v374_v56 = vmul.f32 0.0078125, %v335_v46 }
 0x1c6   :  { %v669_v63 = vpop.eup %668  ;;  %570 = vst [vmem:[#allocation14 + $0x70] sm:$0xff] %v538_v40  ;;  %v501_v9 = vmul.f32 %v469_v5, %v1150_v0  ;;  %v405_v6 = vadd.f32 1e-12, %v373_v13 }
 0x1c7   :  { %v671_v10 = vpop.eup %670  ;;  %v539_v36 = vadd.f32 %v1234_v35, %v500_v30  ;;  %v470_v37 = vmul.f32 %v669_v63, %v1231_v28  ;;  %v406_v32 = vadd.f32 1e-12, %v374_v56  ;;  %v337_v41 = vpop.xlane.xlu1 %336 }
 0x1c8   :  { %v339_v42 = vpop.xlane.xlu0 %338  ;;  %v540_v43 = vadd.f32 %v1234_v35, %v501_v9  ;;  %v471_v33 = vmul.f32 %v671_v10, %v1231_v28  ;;  %680 = vrsqrt.f32 %v405_v6  ;;  %v375_v15 = vmul.f32 0.0078125, %v337_v41 }
 0x1c9   :  { %571 = vst [vmem:[#allocation14 + $0x78] sm:$0xff] %v539_v36  ;;  %v502_v47 = vmul.f32 %v470_v37, %v1153_v17  ;;  %682 = vrsqrt.f32 %v406_v32  ;;  %v376_v0 = vmul.f32 0.0078125, %v339_v42 }
 0x1ca   :  { %v673_v44 = vpop.eup %672  ;;  %572 = vst [vmem:[#allocation14 + $0x80] sm:$0xff] %v540_v43  ;;  %v503_v54 = vmul.f32 %v471_v33, %v1160_v8  ;;  %v407_v7 = vadd.f32 1e-12, %v375_v15 }
 0x1cb   :  { %v675_v45 = vpop.eup %674  ;;  %v541_v38 = vadd.f32 %v1234_v35, %v502_v47  ;;  %v472_v24 = vmul.f32 %v673_v44, %v1231_v28  ;;  %v408_v34 = vadd.f32 1e-12, %v376_v0  ;;  %v341_v49 = vpop.xlane.xlu1 %340 }
 0x1cc   :  { %v343_v50 = vpop.xlane.xlu0 %342  ;;  %v542_v51 = vadd.f32 %v1234_v35, %v503_v54  ;;  %v473_v52 = vmul.f32 %v675_v45, %v1231_v28  ;;  %684 = vrsqrt.f32 %v407_v7  ;;  %v377_v17 = vmul.f32 0.0078125, %v341_v49 }
 0x1cd   :  { %573 = vst [vmem:[#allocation14 + $0x88] sm:$0xff] %v541_v38  ;;  %v504_v39 = vmul.f32 %v472_v24, %v1163_v19  ;;  %686 = vrsqrt.f32 %v408_v34  ;;  %v378_v8 = vmul.f32 0.0078125, %v343_v50 }
 0x1ce   :  { %v677_v53 = vpop.eup %676  ;;  %574 = vst [vmem:[#allocation14 + $0x90] sm:$0xff] %v542_v51  ;;  %v505_v26 = vmul.f32 %v473_v52, %v1170_v12  ;;  %v409_v57 = vadd.f32 1e-12, %v377_v17 }
 0x1cf   :  { %v679_v55 = vpop.eup %678  ;;  %v543_v11 = vadd.f32 %v1234_v35, %v504_v39  ;;  %v474_v58 = vmul.f32 %v677_v53, %v1231_v28  ;;  %v410_v48 = vadd.f32 1e-12, %v378_v8  ;;  %v345_v62 = vpop.xlane.xlu1 %344 }
 0x1d0   :  { %v347_v59 = vpop.xlane.xlu0 %346  ;;  %v544_v60 = vadd.f32 %v1234_v35, %v505_v26  ;;  %v475_v61 = vmul.f32 %v679_v55, %v1231_v28  ;;  %688 = vrsqrt.f32 %v409_v57  ;;  %v379_v19 = vmul.f32 0.0078125, %v345_v62 }
 0x1d1   :  { %575 = vst [vmem:[#allocation14 + $0x98] sm:$0xff] %v543_v11  ;;  %v506_v1 = vmul.f32 %v474_v58, %v1173_v21  ;;  %690 = vrsqrt.f32 %v410_v48  ;;  %v380_v12 = vmul.f32 0.0078125, %v347_v59 }
 0x1d2   :  { %v681_v2 = vpop.eup %680  ;;  %576 = vst [vmem:[#allocation14 + $0xa0] sm:$0xff] %v544_v60  ;;  %v507_v3 = vmul.f32 %v475_v61, %v1180_v14  ;;  %v411_v4 = vadd.f32 1e-12, %v379_v19 }
 0x1d3   :  { %v683_v46 = vpop.eup %682  ;;  %v545_v40 = vadd.f32 %v1234_v35, %v506_v1  ;;  %v476_v5 = vmul.f32 %v681_v2, %v1231_v28  ;;  %v412_v13 = vadd.f32 1e-12, %v380_v12  ;;  %v349_v30 = vpop.xlane.xlu1 %348 }
 0x1d4   :  { %v546_v56 = vadd.f32 %v1234_v35, %v507_v3  ;;  %v477_v63 = vmul.f32 %v683_v46, %v1231_v28  ;;  %692 = vrsqrt.f32 %v411_v4  ;;  %v381_v21 = vmul.f32 0.0078125, %v349_v30 }
 0x1d5   :  { %577 = vst [vmem:[#allocation14 + $0xa8] sm:$0xff] %v545_v40  ;;  %v508_v9 = vmul.f32 %v476_v5, %v1183_v23  ;;  %694 = vrsqrt.f32 %v412_v13 }
 0x1d6   :  { %v685_v6 = vpop.eup %684  ;;  %578 = vst [vmem:[#allocation14 + $0xb0] sm:$0xff] %v546_v56  ;;  %v509_v14 = vmul.f32 %v477_v63, %v1190_v16  ;;  %v413_v10 = vadd.f32 1e-12, %v381_v21 }
 0x1d7   :  { %v687_v36 = vpop.eup %686  ;;  %v547_v37 = vadd.f32 %v1234_v35, %v508_v9  ;;  %v478_v32 = vmul.f32 %v685_v6, %v1231_v28 }
 0x1d8   :  { %v548_v41 = vadd.f32 %v1234_v35, %v509_v14  ;;  %v479_v42 = vmul.f32 %v687_v36, %v1231_v28  ;;  %696 = vrsqrt.f32 %v413_v10 }
 0x1d9   :  { %579 = vst [vmem:[#allocation14 + $0xb8] sm:$0xff] %v547_v37  ;;  %v510_v43 = vmul.f32 %v478_v32, %v1193_v25 }
 0x1da   :  { %v689_v23 = vpop.eup %688  ;;  %580 = vst [vmem:[#allocation14 + $0xc0] sm:$0xff] %v548_v41  ;;  %v511_v33 = vmul.f32 %v479_v42, %v1200_v18 }
 0x1db   :  { %v691_v15 = vpop.eup %690  ;;  %v549_v16 = vadd.f32 %v1234_v35, %v510_v43  ;;  %v480_v47 = vmul.f32 %v689_v23, %v1231_v28 }
 0x1dc   :  { %v550_v0 = vadd.f32 %v1234_v35, %v511_v33  ;;  %v481_v44 = vmul.f32 %v691_v15, %v1231_v28 }
 0x1dd   :  { %581 = vst [vmem:[#allocation14 + $0xc8] sm:$0xff] %v549_v16  ;;  %v512_v54 = vmul.f32 %v480_v47, %v1203_v27 }
 0x1de   :  { %v693_v7 = vpop.eup %692  ;;  %582 = vst [vmem:[#allocation14 + $0xd0] sm:$0xff] %v550_v0  ;;  %v513_v25 = vmul.f32 %v481_v44, %v1210_v20 }
 0x1df   :  { %v695_v45 = vpop.eup %694  ;;  %v551_v38 = vadd.f32 %v1234_v35, %v512_v54  ;;  %v482_v18 = vmul.f32 %v693_v7, %v1231_v28 }
 0x1e0   :  { %v552_v24 = vadd.f32 %v1234_v35, %v513_v25  ;;  %v483_v34 = vmul.f32 %v695_v45, %v1231_v28 }
 0x1e1   :  { %583 = vst [vmem:[#allocation14 + $0xd8] sm:$0xff] %v551_v38  ;;  %v514_v49 = vmul.f32 %v482_v18, %v1213_v29 }
 0x1e2   :  { %v697_v50 = vpop.eup %696  ;;  %584 = vst [vmem:[#allocation14 + $0xe0] sm:$0xff] %v552_v24  ;;  %v515_v27 = vmul.f32 %v483_v34, %v1220_v22 }
 0x1e3   :  { %v553_v51 = vadd.f32 %v1234_v35, %v514_v49  ;;  %v484_v20 = vmul.f32 %v697_v50, %v1231_v28 }
 0x1e4   :  { %v554_v52 = vadd.f32 %v1234_v35, %v515_v27 }
 0x1e5   :  { %585 = vst [vmem:[#allocation14 + $0xe8] sm:$0xff] %v553_v51  ;;  %v516_v17 = vmul.f32 %v484_v20, %v1223_v31 }
 0x1e6   :  { %586 = vst [vmem:[#allocation14 + $0xf0] sm:$0xff] %v554_v52 }
 0x1e7   :  { %v555_v39 = vadd.f32 %v1234_v35, %v516_v17 }
 0x1e9   :  { %587 = vst [vmem:[#allocation14 + $0xf8] sm:$0xff] %v555_v39 }
 0x1ea   :  { %817 = shalt.err (!%p814_p1)
}
 0x1eb   :  { %s818_s24 = scalar_lea.hbm %s1351_s6, 4096 }
 0x1ec   :  { %p819_p2 = scmp.ne.s32.totalorder %s1351_s6, %s818_s24  ;;  %p822_p3 = scmp.lt.u32.totalorder %s818_s24, %s1351_s6 }
 0x1ee   :  { %p824_p4 = pnand %p822_p3, %p819_p2 }
 0x1f0   :  { %827 = shalt.err (!%p824_p4)
}
 0x1f1   :  { %599 = dma.vmem_to_hbm [thread:$0]  %s594_s18, 4096, %s1351_s6, [#allocation8], %s850_s27, %s850_s27, %s851_s28  }
 0x1f2   :  { %840 = dma.done.wait [#allocation8], 4096  }
 0x1f3   :  { %841 = vsyncadd [#allocation8], 4294963200 }
 0x1f4   :  { %603 = vsyncpa [#allocation7], 1 }
 0x1f5   :  { %604 = vsyncpa [#allocation10], 1 }
 0x1f6   :  { %605 = vsyncpa [#allocation13], 1 }
 0x1f7   :  { %606 = vsyncpa [#allocation8], 1 }

</bundles_post_ra>
